<compile_context>
chip_gen: v7x
topology: tpu7x:2x2x1
jax: 0.10.0
libtpu: 0.0.40
codegen_flags: <defaults>
</compile_context>

<pallas_src>
import functools

import jax
import jax.numpy as jnp
from jax import lax
from jax.experimental import pallas as pl
from jax.experimental.pallas import tpu as pltpu


# --------------------------------------------------------------------------
# Tiling helpers (keep every VMEM block <= ~2 MiB so input+output double
# buffering stays well under the 16 MiB scoped-VMEM default on v5e and the
# 32 MiB default / 64 MiB physical budget on v7x).
# --------------------------------------------------------------------------
_BLOCK_BUDGET_BYTES = 2 * 1024 * 1024
_MAX_LANE_TILE = 8192
_MAX_ROW_TILE = 256


def _lane_tile(n_lanes, bytes_per_lane,
               budget=_BLOCK_BUDGET_BYTES, cap=_MAX_LANE_TILE):
    """Pick a lane (last-dim) tile: multiple of 128, bounded by VMEM budget."""
    t = budget // max(1, bytes_per_lane)
    t = min(cap, t)
    t = (t // 128) * 128
    t = max(t, 128)
    if n_lanes <= t:
        return n_lanes, 1          # full dim (allowed regardless of alignment)
    return t, pl.cdiv(n_lanes, t)


def _row_tile(n_rows):
    if n_rows <= _MAX_ROW_TILE:
        return n_rows, 1           # full dim
    return _MAX_ROW_TILE, pl.cdiv(n_rows, _MAX_ROW_TILE)   # multiple of 8/16


# --------------------------------------------------------------------------
# Kernels
# --------------------------------------------------------------------------
def _make_elementwise_kernel(op):
    def kernel(x_ref, o_ref):
        o_ref[...] = op(x_ref[...])
    return kernel


def _softmax_c_kernel(x_ref, o_ref):
    # x_ref: (1, C, TL) ; softmax over axis 1 (channel), f32 accumulation.
    x = x_ref[...].astype(jnp.float32)
    m = jnp.max(x, axis=1, keepdims=True)
    e = jnp.exp(x - m)
    s = jnp.sum(e, axis=1, keepdims=True)
    # EUP approximate reciprocal + one Newton step (keeps the divide off the
    # VALU slot while retaining ~f32 accuracy on the per-column denominator).
    r = pl.reciprocal(s, approx=True)
    r = r * (2.0 - s * r)
    o_ref[...] = (e * r).astype(o_ref.dtype)


def _logsoftmax_c_kernel(x_ref, o_ref):
    x = x_ref[...].astype(jnp.float32)
    m = jnp.max(x, axis=1, keepdims=True)
    s = jnp.sum(jnp.exp(x - m), axis=1, keepdims=True)
    o_ref[...] = ((x - m) - jnp.log(s)).astype(o_ref.dtype)


def _argmax_c_kernel(x_ref, o_ref):
    # x_ref: (1, C, TL) ; argmax over channel axis, first-max-index semantics.
    # TODO(synk): NaN inputs follow "ignore NaN" semantics, not torch's
    #             NaN-propagating argmax.
    x = x_ref[...]
    C = x.shape[1]
    m = jnp.max(x, axis=1, keepdims=True)
    iota = lax.broadcasted_iota(jnp.int32, x.shape, 1)
    idx = jnp.min(jnp.where(x == m, iota, jnp.int32(C)), axis=1, keepdims=True)
    o_ref[...] = idx  # (1, 1, TL) int32


def _argmax_flat_kernel(x_ref, o_ref, max_sc, idx_sc, *, R, L, TR, TL):
    # Streaming global argmax over the row-major flattened tensor.
    # Carries (running max, running first index of max) in VMEM scratch.
    i = pl.program_id(0)
    j = pl.program_id(1)

    @pl.when((i == 0) & (j == 0))
    def _():
        max_sc[...] = jnp.full((1, 1), -jnp.inf, jnp.float32)
        idx_sc[...] = jnp.zeros((1, 1), jnp.int32)

    x = x_ref[...].astype(jnp.float32)
    row = lax.broadcasted_iota(jnp.int32, x.shape, 0) + i * TR
    col = lax.broadcasted_iota(jnp.int32, x.shape, 1) + j * TL
    valid = (row < R) & (col < L)          # mask padded (out-of-bounds) lanes
    xm = jnp.where(valid, x, -jnp.inf)

    tmax = jnp.max(jnp.max(xm, axis=1, keepdims=True), axis=0, keepdims=True)
    sentinel = jnp.int32(jnp.iinfo(jnp.int32).max)
    # TODO(synk): flat index is int32; overflows for tensors with >= 2^31 elems.
    flat = row * jnp.int32(L) + col
    cand = jnp.where((xm == tmax) & valid, flat, sentinel)
    tidx = jnp.min(jnp.min(cand, axis=1, keepdims=True), axis=0, keepdims=True)

    rm = max_sc[...]
    ri = idx_sc[...]
    better = tmax > rm
    equal = tmax == rm
    max_sc[...] = jnp.where(better, tmax, rm)
    idx_sc[...] = jnp.where(better, tidx,
                            jnp.where(equal, jnp.minimum(ri, tidx), ri))

    @pl.when((i == pl.num_programs(0) - 1) & (j == pl.num_programs(1) - 1))
    def _():
        o_ref[...] = idx_sc[...]


# --------------------------------------------------------------------------
# Wrappers (glue: reshapes only; all compute lives in the kernels)
# --------------------------------------------------------------------------
def _elementwise_call(x, op):
    N, C, H, W = x.shape
    rows, lanes = N * C, H * W
    x2 = x.reshape(rows, lanes)
    tr, n_r = _row_tile(rows)
    tl, n_l = _lane_tile(lanes, tr * x.dtype.itemsize)
    out = pl.pallas_call(
        _make_elementwise_kernel(op),
        out_shape=jax.ShapeDtypeStruct((rows, lanes), x.dtype),
        grid=(n_r, n_l),
        in_specs=[pl.BlockSpec((tr, tl), lambda i, j: (i, j))],
        out_specs=pl.BlockSpec((tr, tl), lambda i, j: (i, j)),
        compiler_params=pltpu.CompilerParams(
            dimension_semantics=("parallel", "parallel")),
    )(x2)
    return out.reshape(N, C, H, W)


def _softmax_channel(x, log=False):
    N, C, H, W = x.shape
    HW = H * W
    x3 = x.reshape(N, C, HW)
    tl, n_l = _lane_tile(HW, C * x.dtype.itemsize)
    kernel = _logsoftmax_c_kernel if log else _softmax_c_kernel
    out = pl.pallas_call(
        kernel,
        out_shape=jax.ShapeDtypeStruct((N, C, HW), x.dtype),
        grid=(N, n_l),
        in_specs=[pl.BlockSpec((1, C, tl), lambda i, j: (i, 0, j))],
        out_specs=pl.BlockSpec((1, C, tl), lambda i, j: (i, 0, j)),
        compiler_params=pltpu.CompilerParams(
            dimension_semantics=("parallel", "parallel")),
    )(x3)
    return out.reshape(N, C, H, W)


def _argmax_channel(x):
    # TODO(synk): PyTorch returns int64 indices; TPU kernel emits int32.
    N, C, H, W = x.shape
    HW = H * W
    x3 = x.reshape(N, C, HW)
    tl, n_l = _lane_tile(HW, C * x.dtype.itemsize)
    out = pl.pallas_call(
        _argmax_c_kernel,
        out_shape=jax.ShapeDtypeStruct((N, 1, HW), jnp.int32),
        grid=(N, n_l),
        in_specs=[pl.BlockSpec((1, C, tl), lambda i, j: (i, 0, j))],
        out_specs=pl.BlockSpec((1, 1, tl), lambda i, j: (i, 0, j)),
        compiler_params=pltpu.CompilerParams(
            dimension_semantics=("parallel", "parallel")),
    )(x3)
    return out.reshape(N, H, W)


def _argmax_flat(x):
    # Global argmax over the row-major flattened NCHW tensor (torch dim=None),
    # streamed through a gridded reduction with a carried (max, index).
    N, C, H, W = x.shape
    R, L = N * C, H * W
    x2 = x.reshape(R, L)
    tr, n_r = _row_tile(R)
    tl, n_l = _lane_tile(L, tr * x.dtype.itemsize)
    kernel = functools.partial(_argmax_flat_kernel, R=R, L=L, TR=tr, TL=tl)
    out = pl.pallas_call(
        kernel,
        out_shape=jax.ShapeDtypeStruct((1, 1), jnp.int32),
        grid=(n_r, n_l),
        in_specs=[pl.BlockSpec((tr, tl), lambda i, j: (i, j))],
        out_specs=pl.BlockSpec((1, 1), lambda i, j: (0, 0)),
        scratch_shapes=[pltpu.VMEM((1, 1), jnp.float32),
                        pltpu.VMEM((1, 1), jnp.int32)],
        compiler_params=pltpu.CompilerParams(
            dimension_semantics=("arbitrary", "arbitrary")),
    )(x2)
    return out.reshape(())


# --------------------------------------------------------------------------
# Activation module (mirrors segmentation_models_pytorch.base.modules.Activation)
# --------------------------------------------------------------------------
class Activation:
    def __init__(self, name, **params):
        self.name = name
        self.params = params
        valid = (None, "identity", "sigmoid", "softmax2d", "softmax",
                 "logsoftmax", "tanh", "argmax", "argmax2d", "clamp")
        if not (name in valid or callable(name)):
            raise ValueError(
                "Activation should be callable/sigmoid/softmax/logsoftmax/"
                f"tanh/argmax/argmax2d/clamp/None; got {name}"
            )

    def __call__(self, x):
        name, params = self.name, self.params
        if callable(name):
            # TODO(synk): arbitrary user callables are executed as plain JAX.
            return name(**params)(x)
        if name is None or name == "identity":
            # Identity is free: no HBM round trip through a copy kernel.
            return x
        if name == "sigmoid":
            return _elementwise_call(x, jax.nn.sigmoid)
        if name == "tanh":
            return _elementwise_call(x, jnp.tanh)
        if name == "clamp":
            mn = params.get("min", 0)
            mx = params.get("max", 1)
            return _elementwise_call(x, lambda v: jnp.clip(v, mn, mx))
        if name in ("softmax2d", "softmax", "logsoftmax"):
            # nn.Softmax(dim=None) on a 4D tensor resolves to dim=1, same as
            # softmax2d; only the channel dim is supported here.
            dim = 1 if name == "softmax2d" else params.get("dim", None)
            if dim is None:
                dim = 1  # torch _get_softmax_dim for ndim=4
            if dim != 1:
                # TODO(synk): non-channel softmax dims would need a transpose glue path.
                raise NotImplementedError("only dim=1 (channel) softmax supported")
            return _softmax_channel(x, log=(name == "logsoftmax"))
        if name == "argmax2d":
            return _argmax_channel(x)
        if name == "argmax":
            dim = params.get("dim", None)
            if dim is None:
                return _argmax_flat(x)
            if dim == 1:
                return _argmax_channel(x)
            # TODO(synk): argmax over dims other than 1/None not implemented.
            raise NotImplementedError("argmax only supports dim=None or dim=1")
        raise ValueError(name)


# --------------------------------------------------------------------------
# Demo / correctness check
# --------------------------------------------------------------------------
if __name__ == "__main__":
    key = jax.random.PRNGKey(0)
    x = jax.random.normal(key, (2, 4, 16, 16), dtype=jnp.float32)

    # run every supported activation once
    results = {}
    for name in ["identity", "sigmoid", "softmax2d", "softmax", "logsoftmax",
                 "tanh", "argmax", "argmax2d", "clamp"]:
        y = Activation(name)(x)
        results[name] = jax.block_until_ready(y)

    # reference checks (plain JAX)
    assert jnp.allclose(results["identity"], x)
    assert jnp.allclose(results["sigmoid"], jax.nn.sigmoid(x), atol=1e-5)
    assert jnp.allclose(results["tanh"], jnp.tanh(x), atol=1e-5)
    assert jnp.allclose(results["clamp"], jnp.clip(x, 0, 1), atol=1e-6)
    # softmax uses EUP approx reciprocal + Newton refinement -> ~1e-5 accurate
    assert jnp.allclose(results["softmax2d"], jax.nn.softmax(x, axis=1), atol=1e-4)
    assert jnp.allclose(results["softmax"], jax.nn.softmax(x, axis=1), atol=1e-4)
    assert jnp.allclose(results["logsoftmax"], jax.nn.log_softmax(x, axis=1), atol=1e-5)
    assert results["argmax2d"].shape == (2, 16, 16)
    assert jnp.array_equal(results["argmax2d"], jnp.argmax(x, axis=1).astype(jnp.int32))
    assert results["argmax"].shape == ()
    assert int(results["argmax"]) == int(jnp.argmax(x))

    print("KERNEL_OK")
</pallas_src>

<mosaic_0001>
module attributes {stable_mosaic.version = 11 : i64} {
  func.func @kernel(%arg0: i32, %arg1: i32, %arg2: memref<8x256xf32, #tpu.memory_space<vmem>>, %arg3: memref<8x256xf32, #tpu.memory_space<vmem>>) attributes {dimension_semantics = [#tpu.dimension_semantics<parallel>, #tpu.dimension_semantics<parallel>], iteration_bounds = array<i64: 1, 1>, scalar_prefetch = 0 : i64, scratch_operands = 0 : i64, tpu.core_type = #tpu.core_type<tc>, window_params = [{transform_indices = @transform_0, window_bounds = array<i64: 8, 256>}, {transform_indices = @transform_1, window_bounds = array<i64: 8, 256>}]} {
    %c0 = arith.constant 0 : index
    %c0_0 = arith.constant 0 : index
    %0 = vector.load %arg2[%c0, %c0_0] : memref<8x256xf32, #tpu.memory_space<vmem>>, vector<8x256xf32>
    %1 = arith.negf %0 : vector<8x256xf32>
    %2 = math.exp %1 : vector<8x256xf32>
    %cst = arith.constant 1.000000e+00 : f32
    %3 = vector.broadcast %cst : f32 to vector<8x256xf32>
    %4 = arith.addf %3, %2 : vector<8x256xf32>
    %5 = arith.divf %3, %4 : vector<8x256xf32>
    %c0_1 = arith.constant 0 : index
    %c0_2 = arith.constant 0 : index
    %6 = vector.load %arg3[%c0_1, %c0_2] : memref<8x256xf32, #tpu.memory_space<vmem>>, vector<8x256xf32>
    tpu.vector_store %arg3[%c0_1, %c0_2], %5 {strides = array<i32>} : memref<8x256xf32, #tpu.memory_space<vmem>>, vector<8x256xf32>,
    return
  }
  func.func @transform_0(%arg0: i32, %arg1: i32) -> (i32, i32) {
    %c0_i32 = arith.constant 0 : i32
    return %arg0, %arg1 : i32, i32
  }
  func.func @transform_1(%arg0: i32, %arg1: i32) -> (i32, i32) {
    %c0_i32 = arith.constant 0 : i32
    return %arg0, %arg1 : i32, i32
  }
}

</mosaic_0001>

<bundles_post_ra>
// kernel: tpu_custom_call.1
= control target key start
LH: loop header
LB: loop body
LE: loop exit
PB: predicated region body
PF: predicated region fallthrough
CT: control target
= control target key end

     0   :  { %6 = vsyncpa [#allocation3], 0  ;;  %s148_s0 = inlined_call_operand.hbm [shape: f32[8,256], index: 0, kind: input, shape index: {}]   ;;  %s149_s1 = inlined_call_operand.hbm [shape: f32[8,256], index: 1, kind: output, shape index: {}]  }
   0x1   :  { %7 = vsyncpa [#allocation4], 0  ;;  %s112_s6 = smov [#allocation2]   ;;  %s64_s10 = scalar_lea.hbm %s148_s0, 256 }
   0x2   :  { %s14_s7 = sshll.u32 %s112_s6, 4  ;;  %p65_p0 = scmp.ne.s32.totalorder %s148_s0, %s64_s10  ;;  %s15_s7 = int_to_ptr.vmem [resolvable:$true] %s14_s7 }
   0x3   :  { %p68_p1 = scmp.lt.u32.totalorder %s64_s10, %s148_s0 }
   0x5   :  { %p70_p2 = pnand %p68_p1, %p65_p0 }
   0x7   :  { %73 = shalt.err (!%p70_p2)
}
   0x8   :  { %s74_s15 = scalar_lea.vmem %s15_s7, 256  ;;  %p79_p4 = scmp.lt.s32.totalorder %s15_s7, %s15_s7 }
   0x9   :  { %p75_p3 = scmp.ne.s32.totalorder %s15_s7, %s74_s15  ;;  %p80_p5 = scmp.lt.s32.totalorder %s74_s15, %s74_s15 }
   0xb   :  { %p81_p6 = por %p80_p5, %p79_p4 }
   0xd   :  { %p82_p7 = pnand %p81_p6, %p75_p3 }
   0xf   :  { %85 = shalt.err (!%p82_p7)
}
  0x10   :  { %17 = dma.hbm_to_vmem [thread:$0]  %s148_s0, 256, %s15_s7, [#allocation3]  }
  0x11   :  { %108 = dma.done.wait [#allocation3], 256  }
  0x12   :  { %109 = vsyncadd [#allocation3], 4294967040  ;;  %v21_v0 = vld [vmem:[#allocation2] sm:$0xff]  ;;  %v22_v1 = vld [vmem:[#allocation2 + $0x8] sm:$0xff]  ;;  %s113_s18 = smov [#allocation5]  }
  0x13   :  { %v52_v2 = vmul.f32 -1.442695, %v21_v0  ;;  %v53_v3 = vmul.f32 -1.442695, %v22_v1  ;;  %s43_s19 = sshll.u32 %s113_s18, 4  ;;  %s44_s19 = int_to_ptr.vmem [resolvable:$true] %s43_s19 }
  0x14   :  { %s86_s0 = scalar_lea.vmem %s44_s19, 256  ;;  %p91_p9 = scmp.lt.s32.totalorder %s44_s19, %s44_s19 }
  0x15   :  { %56 = vpow2.f32 %v52_v2  ;;  %p87_p8 = scmp.ne.s32.totalorder %s44_s19, %s86_s0  ;;  %p92_p10 = scmp.lt.s32.totalorder %s86_s0, %s86_s0 }
  0x16   :  { %58 = vpow2.f32 %v53_v3 }
  0x17   :  { %p93_p11 = por %p92_p10, %p91_p9 }
  0x19   :  { %p94_p12 = pnand %p93_p11, %p87_p8 }
  0x1f   :  { %v57_v4 = vpop.eup %56 }
  0x20   :  { %v59_v5 = vpop.eup %58  ;;  %v29_v6 = vadd.f32 1.0, %v57_v4 }
  0x21   :  { %v30_v7 = vadd.f32 1.0, %v59_v5 }
  0x22   :  { %60 = vrcp.f32 %v29_v6 }
  0x23   :  { %62 = vrcp.f32 %v30_v7 }
  0x2c   :  { %v61_v8 = vpop.eup %60 }
  0x2d   :  { %v63_v9 = vpop.eup %62  ;;  %35 = vst [vmem:[#allocation5] sm:$0xff] %v61_v8 }
  0x2e   :  { %36 = vst [vmem:[#allocation5 + $0x8] sm:$0xff] %v63_v9 }
  0x2f   :  { %97 = shalt.err (!%p94_p12)
}
  0x30   :  { %s98_s22 = scalar_lea.hbm %s149_s1, 256 }
  0x31   :  { %p99_p13 = scmp.ne.s32.totalorder %s149_s1, %s98_s22  ;;  %p102_p0 = scmp.lt.u32.totalorder %s98_s22, %s149_s1 }
  0x33   :  { %p104_p1 = pnand %p102_p0, %p99_p13 }
  0x35   :  { %107 = shalt.err (!%p104_p1)
}
  0x36   :  { %46 = dma.vmem_to_hbm [thread:$0]  %s44_s19, 256, %s149_s1, [#allocation4]  }
  0x37   :  { %110 = dma.done.wait [#allocation4], 256  }
  0x38   :  { %111 = vsyncadd [#allocation4], 4294967040 }
  0x39   :  { %50 = vsyncpa [#allocation3], 1 }
  0x3a   :  { %51 = vsyncpa [#allocation4], 1 }

</bundles_post_ra>
